<compile_context>
chip_gen: v7x
topology: tpu7x:2x2x1
jax: 0.10.0
libtpu: 0.0.40
codegen_flags: <defaults>
</compile_context>

<pallas_src>
import jax
import jax.numpy as jnp
from jax.experimental import pallas as pl
from jax.experimental.pallas import tpu as pltpu


def _round_up(x, m):
    return ((x + m - 1) // m) * m


def _vmem_capacity_bytes():
    try:
        info = pltpu.get_tpu_info()
        for attr in ("vmem_capacity_bytes", "vmem_bytes", "vmem_size_bytes"):
            v = getattr(info, attr, None)
            if v:
                return int(v)
    except Exception:
        pass
    return 64 * 1024 * 1024   # conservative (v7x-sized) default


def _vmem_estimate(n_pad, tn, tp, F):
    """Rough per-core VMEM footprint (bytes) incl. double buffers & temporaries."""
    f8, f4 = 8 * F, 4 * F
    b = 0
    b += n_pad * f8 * 2                    # gather source slab (bf16, resident)
    b += 2 * tn * f4 * 4                   # output block (f32, revisited)
    b += 2 * tn * f4 * 4                   # [q|mu] init input (f32, dbl-buffered)
    b += 2 * tp * f8 * 4                   # filter stream (f32, dbl-buffered)
    b += 2 * tp * 128 * 4                  # idx_j [tp,1] blocks (lane-padded)
    b += 2 * 8 * tp * 4                    # idx_i [1,tp] blocks (sublane-padded)
    b += tp * n_pad * 4 + tn * tp * 4      # iota id scratches (int32)
    b += tp * n_pad * 2 + tn * tp * 2      # one-hot temporaries (bf16)
    b += 3 * tp * f8 * 4                   # gathered / prod / vals temporaries
    return b


def _painn_pair_kernel(src_ref, w_ref, idx_j_ref, idx_i_ref, init_ref, out_ref,
                       col_ids_ref, row_ids_ref):
    tn, f4 = out_ref.shape                 # (atom tile, 4F)
    n_pad = src_ref.shape[0]
    tp = w_ref.shape[0]

    # Once per atom tile (first pair tile): accumulator init + iota id planes.
    @pl.when(pl.program_id(1) == 0)
    def _init():
        out_ref[...] = init_ref[...]
        col_ids_ref[...] = jax.lax.broadcasted_iota(jnp.int32, (tp, n_pad), 1)
        row_ids_ref[...] = jax.lax.broadcasted_iota(jnp.int32, (tn, tp), 0)

    # --- gather: one-hot [tp, N] @ src [N, 8F]  (bf16 MXU, f32 accumulate) ---
    oh_j = (col_ids_ref[...] == idx_j_ref[0]).astype(jnp.bfloat16)       # [tp, N]
    gathered = jnp.dot(oh_j, src_ref[...], preferred_element_type=jnp.float32)

    # --- per-pair filter: one full-width multiply + one half-width add ------
    prod = gathered * w_ref[...]                                          # [tp, 8F]
    vals = (prod[:, :f4] + prod[:, f4:]).astype(jnp.bfloat16)             # [tp, 4F]

    # --- scatter-add into the local atom rows: one-hot [tn, tp] @ vals ------
    idx_i_local = idx_i_ref[0] - pl.program_id(0) * tn                    # [1, tp]
    oh_i = (row_ids_ref[...] == idx_i_local).astype(jnp.bfloat16)         # [tn, tp]
    out_ref[...] += jnp.dot(oh_i, vals, preferred_element_type=jnp.float32)


def painn_interaction(q, mu, Wij, dir_ij, idx_i, idx_j, n_atoms, params,
                      *, pair_tile=None, atom_tile=512):
    """q: [N,1,F], mu: [N,3,F], Wij: [P,1,3F], dir_ij: [P,3], idx_*: [P] int."""
    w1, b1, w2, b2 = params
    N = int(n_atoms)
    F = q.shape[-1]
    P = idx_i.shape[0]

    if P == 0:                              # no pairs -> no interaction update
        return q, mu

    # ---- context MLP + gather-source / filter-stream prep (plain XLA) -----
    qf = q.reshape(N, F).astype(jnp.float32)
    muf = mu.reshape(N, 3, F).astype(jnp.float32)
    h = jax.nn.silu(qf @ w1.astype(jnp.float32)
                    + b1.reshape(1, F).astype(jnp.float32))
    x = h @ w2.astype(jnp.float32) + b2.reshape(1, 3 * F).astype(jnp.float32)
    x_lo, x_mid, x_hi = x[:, :F], x[:, F:2 * F], x[:, 2 * F:]
    src = jnp.concatenate(
        [x_lo, x_mid, x_mid, x_mid,
         jnp.zeros((N, F), jnp.float32),
         x_hi * muf[:, 0], x_hi * muf[:, 1], x_hi * muf[:, 2]], axis=1)    # [N, 8F]

    wf = Wij.reshape(P, 3 * F).astype(jnp.float32)
    d = dir_ij.astype(jnp.float32)
    w_lo, w_mid, w_hi = wf[:, :F], wf[:, F:2 * F], wf[:, 2 * F:]
    wstream = jnp.concatenate(
        [w_lo, w_mid * d[:, 0:1], w_mid * d[:, 1:2], w_mid * d[:, 2:3],
         jnp.zeros((P, F), jnp.float32), w_hi, w_hi, w_hi], axis=1)        # [P, 8F]

    out_init = jnp.concatenate([qf, muf.reshape(N, 3 * F)], axis=1)        # [N, 4F]

    # ---- generation-aware tiling -------------------------------------------
    vmem_cap = _vmem_capacity_bytes()
    atom_tile = max(128, _round_up(atom_tile, 128))
    if N <= atom_tile:
        tn, num_at = _round_up(N, 128), 1
    else:
        num_at = -(-N // atom_tile)
        tn = _round_up(-(-N // num_at), 128)
    n_pad = tn * num_at

    if pair_tile is None:
        # 128 MiB VMEM (v5e/v6e) -> bigger pair tiles; 64 MiB (v7x) -> smaller.
        pair_tile = 1024 if vmem_cap >= 96 * 1024 * 1024 else 512
    tp = max(128, _round_up(min(pair_tile, _round_up(P, 128)), 128))
    while tp > 128 and _vmem_estimate(n_pad, tn, tp, F) > (3 * vmem_cap) // 5:
        tp = max(128, _round_up(tp // 2, 128))
    p_pad = _round_up(P, tp)
    num_pt = p_pad // tp

    vmem_limit = int(min(vmem_cap - vmem_cap // 8,
                         max(32 * 1024 * 1024,
                             2 * _vmem_estimate(n_pad, tn, tp, F))))

    # ---- padded device buffers ---------------------------------------------
    # Padded atom rows of src / init are explicitly zero; padded pairs point at
    # the never-matching row index n_pad and carry a zero filter.
    src_p = jnp.zeros((n_pad, 8 * F), jnp.bfloat16).at[:N].set(
        src.astype(jnp.bfloat16))
    init_p = jnp.zeros((n_pad, 4 * F), jnp.float32).at[:N].set(out_init)
    w_p = jnp.zeros((p_pad, 8 * F), jnp.float32).at[:P].set(wstream)
    idx_j_p = jnp.full((p_pad,), n_pad, jnp.int32).at[:P].set(
        idx_j.astype(jnp.int32)).reshape(num_pt, tp, 1)
    idx_i_p = jnp.full((p_pad,), n_pad, jnp.int32).at[:P].set(
        idx_i.astype(jnp.int32)).reshape(num_pt, 1, tp)

    out = pl.pallas_call(
        _painn_pair_kernel,
        out_shape=jax.ShapeDtypeStruct((n_pad, 4 * F), jnp.float32),
        grid=(num_at, num_pt),
        in_specs=[
            pl.BlockSpec((n_pad, 8 * F), lambda a, t: (0, 0)),   # gather source
            pl.BlockSpec((tp, 8 * F), lambda a, t: (t, 0)),      # filter stream
            pl.BlockSpec((1, tp, 1), lambda a, t: (t, 0, 0)),    # idx_j column
            pl.BlockSpec((1, 1, tp), lambda a, t: (t, 0, 0)),    # idx_i row
            pl.BlockSpec((tn, 4 * F), lambda a, t: (a, 0)),      # [q|mu] init
        ],
        out_specs=pl.BlockSpec((tn, 4 * F), lambda a, t: (a, 0)),
        scratch_shapes=[
            pltpu.VMEM((tp, n_pad), jnp.int32),                  # gather col ids
            pltpu.VMEM((tn, tp), jnp.int32),                     # scatter row ids
        ],
        input_output_aliases={4: 0},                             # init -> out
        compiler_params=pltpu.CompilerParams(
            dimension_semantics=("parallel", "arbitrary"),
            vmem_limit_bytes=vmem_limit,
        ),
    )(src_p, w_p, idx_j_p, idx_i_p, init_p)

    q_out = out[:N, :F].reshape(N, 1, F).astype(q.dtype)
    mu_out = out[:N, F:].reshape(N, 3, F).astype(mu.dtype)
    return q_out, mu_out


def painn_interaction_ref(q, mu, Wij, dir_ij, idx_i, idx_j, n_atoms, params):
    """Pure-JAX f32 reference mirroring the PyTorch forward."""
    w1, b1, w2, b2 = params
    F = q.shape[-1]
    x = jax.nn.silu(q @ w1 + b1) @ w2 + b2                          # [N,1,3F]
    xj = x[idx_j]                                                   # [P,1,3F]
    muj = mu[idx_j]                                                 # [P,3,F]
    xw = Wij * xj
    dq, dmuR, dmumu = xw[..., :F], xw[..., F:2 * F], xw[..., 2 * F:]
    dq = jax.ops.segment_sum(dq, idx_i, num_segments=n_atoms)
    dmu = dmuR * dir_ij[..., None] + dmumu * muj
    dmu = jax.ops.segment_sum(dmu, idx_i, num_segments=n_atoms)
    return q + dq, mu + dmu


if __name__ == "__main__":
    n_atoms = 8          # N
    n_atom_basis = 32    # F
    n_pairs = 16         # P

    key = jax.random.PRNGKey(0)
    keys = jax.random.split(key, 10)

    # deterministic "module parameters" (snn.Dense == nn.Linear: y = x @ W + b)
    w1 = 0.1 * jax.random.normal(keys[0], (n_atom_basis, n_atom_basis), jnp.float32)
    b1 = 0.1 * jax.random.normal(keys[1], (n_atom_basis,), jnp.float32)
    w2 = 0.1 * jax.random.normal(keys[2], (n_atom_basis, 3 * n_atom_basis), jnp.float32)
    b2 = 0.1 * jax.random.normal(keys[3], (3 * n_atom_basis,), jnp.float32)
    params = (w1, b1, w2, b2)

    # deterministic inputs (schnetpack shape conventions)
    q = jax.random.normal(keys[4], (n_atoms, 1, n_atom_basis), jnp.float32)
    mu = jax.random.normal(keys[5], (n_atoms, 3, n_atom_basis), jnp.float32)
    Wij = jax.random.normal(keys[6], (n_pairs, 1, 3 * n_atom_basis), jnp.float32)
    dir_ij = jax.random.normal(keys[7], (n_pairs, 3), jnp.float32)
    idx_i = jax.random.randint(keys[8], (n_pairs,), 0, n_atoms, jnp.int32)
    idx_j = jax.random.randint(keys[9], (n_pairs,), 0, n_atoms, jnp.int32)

    painn_jit = jax.jit(painn_interaction, static_argnames=("n_atoms",))
    q_out, mu_out = painn_jit(q, mu, Wij, dir_ij, idx_i, idx_j,
                              n_atoms=n_atoms, params=params)
    jax.block_until_ready((q_out, mu_out))

    q_exp, mu_exp = painn_interaction_ref(q, mu, Wij, dir_ij, idx_i, idx_j,
                                          n_atoms, params)
    assert q_out.shape == q_exp.shape and mu_out.shape == mu_exp.shape
    # Gather source / scatter values are bf16 MXU operands -> loosened tolerances
    # (Wij / dir stay f32 on the VPU path).
    assert jnp.allclose(q_out, q_exp, atol=2e-2, rtol=2e-2)
    assert jnp.allclose(mu_out, mu_exp, atol=2e-2, rtol=2e-2)

    print("KERNEL_OK")
</pallas_src>

<mosaic_0001>
module attributes {stable_mosaic.version = 11 : i64} {
  func.func @_painn_pair_kernel(%arg0: i32, %arg1: i32, %arg2: memref<128x256xbf16, #tpu.memory_space<vmem>>, %arg3: memref<128x256xf32, #tpu.memory_space<vmem>>, %arg4: memref<1x128x1xi32, #tpu.memory_space<vmem>>, %arg5: memref<1x1x128xi32, #tpu.memory_space<vmem>>, %arg6: memref<128x128xf32, #tpu.memory_space<vmem>>, %arg7: memref<128x128xf32, #tpu.memory_space<vmem>>, %arg8: memref<128x128xi32, #tpu.memory_space<vmem>>, %arg9: memref<128x128xi32, #tpu.memory_space<vmem>>) attributes {dimension_semantics = [#tpu.dimension_semantics<parallel>, #tpu.dimension_semantics<arbitrary>], iteration_bounds = array<i64: 1, 1>, scalar_prefetch = 0 : i64, scratch_operands = 2 : i64, tpu.core_type = #tpu.core_type<tc>, window_params = [{pipeline_mode = #tpu.pipeline_mode<synchronous>, transform_indices = @transform_0, window_bounds = array<i64: 128, 256>}, {transform_indices = @transform_1, window_bounds = array<i64: 128, 256>}, {transform_indices = @transform_2, window_bounds = array<i64: 1, 128, 1>}, {transform_indices = @transform_3, window_bounds = array<i64: 1, 1, 128>}, {transform_indices = @transform_4, window_bounds = array<i64: 128, 128>}, {transform_indices = @transform_5, window_bounds = array<i64: 128, 128>}]} {
    %c0_i32 = arith.constant 0 : i32
    %0 = arith.cmpi eq, %arg1, %c0_i32 : i32
    %1 = arith.extui %0 : i1 to i32
    %c0_i32_0 = arith.constant 0 : i32
    %2 = arith.cmpi ne, %1, %c0_i32_0 : i32
    scf.if %2 {
      %c0_19 = arith.constant 0 : index
      %c0_20 = arith.constant 0 : index
      %34 = vector.load %arg6[%c0_19, %c0_20] : memref<128x128xf32, #tpu.memory_space<vmem>>, vector<128x128xf32>
      %c0_21 = arith.constant 0 : index
      %c0_22 = arith.constant 0 : index
      %35 = vector.load %arg7[%c0_21, %c0_22] : memref<128x128xf32, #tpu.memory_space<vmem>>, vector<128x128xf32>
      tpu.vector_store %arg7[%c0_21, %c0_22], %34 {strides = array<i32>} : memref<128x128xf32, #tpu.memory_space<vmem>>, vector<128x128xf32>,
      %36 = tpu.iota {dimensions = array<i32: 1>} : vector<128x128xi32>
      %c0_23 = arith.constant 0 : index
      %c0_24 = arith.constant 0 : index
      %37 = vector.load %arg8[%c0_23, %c0_24] : memref<128x128xi32, #tpu.memory_space<vmem>>, vector<128x128xi32>
      tpu.vector_store %arg8[%c0_23, %c0_24], %36 {strides = array<i32>} : memref<128x128xi32, #tpu.memory_space<vmem>>, vector<128x128xi32>,
      %38 = tpu.iota {dimensions = array<i32: 0>} : vector<128x128xi32>
      %c0_25 = arith.constant 0 : index
      %c0_26 = arith.constant 0 : index
      %39 = vector.load %arg9[%c0_25, %c0_26] : memref<128x128xi32, #tpu.memory_space<vmem>>, vector<128x128xi32>
      tpu.vector_store %arg9[%c0_25, %c0_26], %38 {strides = array<i32>} : memref<128x128xi32, #tpu.memory_space<vmem>>, vector<128x128xi32>,
    } else {
    }
    %c0 = arith.constant 0 : index
    %c0_1 = arith.constant 0 : index
    %3 = vector.load %arg8[%c0, %c0_1] : memref<128x128xi32, #tpu.memory_space<vmem>>, vector<128x128xi32>
    %c0_2 = arith.constant 0 : index
    %c0_3 = arith.constant 0 : index
    %c0_4 = arith.constant 0 : index
    %4 = vector.load %arg4[%c0_2, %c0_3, %c0_4] : memref<1x128x1xi32, #tpu.memory_space<vmem>>, vector<1x128x1xi32>
    %5 = vector.shape_cast %4 : vector<1x128x1xi32> to vector<128x1xi32>
    %6 = vector.broadcast %5 : vector<128x1xi32> to vector<128x128xi32>
    %7 = arith.cmpi eq, %3, %6 : vector<128x128xi32>
    %8 = arith.extui %7 : vector<128x128xi1> to vector<128x128xi32>
    %9 = arith.sitofp %8 : vector<128x128xi32> to vector<128x128xf32>
    %10 = arith.truncf %9 : vector<128x128xf32> to vector<128x128xbf16>
    %c0_5 = arith.constant 0 : index
    %c0_6 = arith.constant 0 : index
    %11 = vector.load %arg2[%c0_5, %c0_6] : memref<128x256xbf16, #tpu.memory_space<vmem>>, vector<128x256xbf16>
    %cst = arith.constant dense<0.000000e+00> : vector<128x256xf32>
    %12 = tpu.matmul %10, %11, %cst {dimension_numbers = #tpu.dot_dimension_numbers<[1], [0], [0], [1], [0, 0, 1, 1], [], []>} : vector<128x128xbf16>, vector<128x256xbf16>, vector<128x256xf32> -> vector<128x256xf32>
    %c0_7 = arith.constant 0 : index
    %c0_8 = arith.constant 0 : index
    %13 = vector.load %arg3[%c0_7, %c0_8] : memref<128x256xf32, #tpu.memory_space<vmem>>, vector<128x256xf32>
    %14 = arith.mulf %12, %13 : vector<128x256xf32>
    %15 = vector.extract_strided_slice %14 {offsets = [0, 0], sizes = [128, 128], strides = [1, 1]} : vector<128x256xf32> to vector<128x128xf32>
    %16 = vector.extract_strided_slice %14 {offsets = [0, 128], sizes = [128, 128], strides = [1, 1]} : vector<128x256xf32> to vector<128x128xf32>
    %17 = arith.addf %15, %16 : vector<128x128xf32>
    %18 = arith.truncf %17 : vector<128x128xf32> to vector<128x128xbf16>
    %c0_9 = arith.constant 0 : index
    %c0_10 = arith.constant 0 : index
    %c0_11 = arith.constant 0 : index
    %19 = vector.load %arg5[%c0_9, %c0_10, %c0_11] : memref<1x1x128xi32, #tpu.memory_space<vmem>>, vector<1x1x128xi32>
    %20 = vector.shape_cast %19 : vector<1x1x128xi32> to vector<1x128xi32>
    %c128_i32 = arith.constant 128 : i32
    %21 = arith.muli %arg0, %c128_i32 : i32
    %22 = vector.broadcast %21 : i32 to vector<1x128xi32>
    %23 = arith.subi %20, %22 : vector<1x128xi32>
    %c0_12 = arith.constant 0 : index
    %c0_13 = arith.constant 0 : index
    %24 = vector.load %arg9[%c0_12, %c0_13] : memref<128x128xi32, #tpu.memory_space<vmem>>, vector<128x128xi32>
    %25 = vector.broadcast %23 : vector<1x128xi32> to vector<128x128xi32>
    %26 = arith.cmpi eq, %24, %25 : vector<128x128xi32>
    %27 = arith.extui %26 : vector<128x128xi1> to vector<128x128xi32>
    %28 = arith.sitofp %27 : vector<128x128xi32> to vector<128x128xf32>
    %29 = arith.truncf %28 : vector<128x128xf32> to vector<128x128xbf16>
    %c0_14 = arith.constant 0 : index
    %c0_15 = arith.constant 0 : index
    %30 = vector.load %arg7[%c0_14, %c0_15] : memref<128x128xf32, #tpu.memory_space<vmem>>, vector<128x128xf32>
    %cst_16 = arith.constant dense<0.000000e+00> : vector<128x128xf32>
    %31 = tpu.matmul %29, %18, %cst_16 {dimension_numbers = #tpu.dot_dimension_numbers<[1], [0], [0], [1], [0, 0, 1, 1], [], []>} : vector<128x128xbf16>, vector<128x128xbf16>, vector<128x128xf32> -> vector<128x128xf32>
    %32 = arith.addf %30, %31 : vector<128x128xf32>
    %c0_17 = arith.constant 0 : index
    %c0_18 = arith.constant 0 : index
    %33 = vector.load %arg7[%c0_17, %c0_18] : memref<128x128xf32, #tpu.memory_space<vmem>>, vector<128x128xf32>
    tpu.vector_store %arg7[%c0_17, %c0_18], %32 {strides = array<i32>} : memref<128x128xf32, #tpu.memory_space<vmem>>, vector<128x128xf32>,
    return
  }
  func.func @transform_0(%arg0: i32, %arg1: i32) -> (i32, i32) {
    %c0_i32 = arith.constant 0 : i32
    %c0_i32_0 = arith.constant 0 : i32
    %c0_i32_1 = arith.constant 0 : i32
    return %c0_i32, %c0_i32_0 : i32, i32
  }
  func.func @transform_1(%arg0: i32, %arg1: i32) -> (i32, i32) {
    %c0_i32 = arith.constant 0 : i32
    %c0_i32_0 = arith.constant 0 : i32
    return %arg1, %c0_i32 : i32, i32
  }
  func.func @transform_2(%arg0: i32, %arg1: i32) -> (i32, i32, i32) {
    %c0_i32 = arith.constant 0 : i32
    %c0_i32_0 = arith.constant 0 : i32
    %c0_i32_1 = arith.constant 0 : i32
    return %arg1, %c0_i32, %c0_i32_0 : i32, i32, i32
  }
  func.func @transform_3(%arg0: i32, %arg1: i32) -> (i32, i32, i32) {
    %c0_i32 = arith.constant 0 : i32
    %c0_i32_0 = arith.constant 0 : i32
    %c0_i32_1 = arith.constant 0 : i32
    return %arg1, %c0_i32, %c0_i32_0 : i32, i32, i32
  }
  func.func @transform_4(%arg0: i32, %arg1: i32) -> (i32, i32) {
    %c0_i32 = arith.constant 0 : i32
    %c0_i32_0 = arith.constant 0 : i32
    return %arg0, %c0_i32 : i32, i32
  }
  func.func @transform_5(%arg0: i32, %arg1: i32) -> (i32, i32) {
    %c0_i32 = arith.constant 0 : i32
    %c0_i32_0 = arith.constant 0 : i32
    return %arg0, %c0_i32 : i32, i32
  }
}

</mosaic_0001>

<bundles_post_ra>
// kernel: painn_interaction.1
= control target key start
LH: loop header
LB: loop body
LE: loop exit
PB: predicated region body
PF: predicated region fallthrough
CT: control target
= control target key end

     0   :  { %v927_v0 = vmov 0   ;;  %v57_v33 = vlaneseq  ;;  %v928_v38 = vmov 1.0|1.0   ;;  %s1318_s2 = inlined_call_operand.vmem [shape: s32[1,128,1], index: 2, kind: input, shape index: {}]   ;;  %s1319_s0 = inlined_call_operand.vmem [shape: bf16[128,256], index: 0, kind: input, shape index: {}]   ;;  %s1320_s3 = inlined_call_operand.vmem [shape: s32[1,1,128], index: 3, kind: input, shape index: {}]   ;;  %s1321_s1 = inlined_call_operand.vmem [shape: f32[128,256], index: 1, kind: input, shape index: {}]   ;;  %s1322_s4 = inlined_call_operand.vmem [shape: f32[128,128], index: 4, kind: input, shape index: {}, may-alias: {4,5}]   ;;  %s1323_s5 = inlined_call_operand.vmem [shape: f32[128,128], index: 5, kind: output, shape index: {}, may-alias: {4,5}]  }
   0x1   :  { %902 = vset.pattern.permute.xlu1 %v927_v0  ;;  %901 = vset.pattern.permute.xlu0 %v927_v0  ;;  %v126_v1 = vld [vmem:[%s1318_s2 + $0x10] sm:$0xff]  ;;  %v124_v2 = vld [vmem:[%s1318_s2] sm:$0xff]  ;;  %v127_v3 = vld [vmem:[%s1318_s2 + $0x18] sm:$0xff] }
   0x2   :  { %147 = vperm.xlu1 %902, %v126_v1   ;;  %141 = vperm.xlu0 %901, %v124_v2   ;;  %v125_v4 = vld [vmem:[%s1318_s2 + $0x8] sm:$0xff]  ;;  %v128_v6 = vld [vmem:[%s1318_s2 + $0x20] sm:$0xff]  ;;  %v906_v9 = vld [vmem:[%s1319_s0 + $0x14] ss:$8 sps:$4 sm:$0xff]   ;;  %v58_v35 = vand.u32 127, %v57_v33  ;;  %v76_v52 = vshrl.u32 %v57_v33, 7 }
   0x3   :  { %372 = vmatprep.mubr.bf16.mxu0 %v927_v0  ;;  %v129_v5 = vld [vmem:[%s1318_s2 + $0x28] sm:$0xff]  ;;  %v131_v10 = vld [vmem:[%s1318_s2 + $0x38] sm:$0xff]  ;;  %v130_v11 = vld [vmem:[%s1318_s2 + $0x30] sm:$0xff] }
   0x4   :  { %v903_v7 = vld [vmem:[%s1319_s0 + $0x4] ss:$8 sps:$4 sm:$0xff]   ;;  %v905_v8 = vld [vmem:[%s1319_s0] ss:$8 sps:$4 sm:$0xff]   ;;  %v908_v12 = vld [vmem:[%s1319_s0 + $0x10] ss:$8 sps:$4 sm:$0xff]  }
   0x5   :  { %340 = vmatprep.subr.bf16.mxu0 %v903_v7  ;;  %v909_v13 = vld [vmem:[%s1319_s0 + $0x24] ss:$8 sps:$4 sm:$0xff]   ;;  %v911_v16 = vld [vmem:[%s1319_s0 + $0x20] ss:$8 sps:$4 sm:$0xff]   ;;  %v912_v17 = vld [vmem:[%s1319_s0 + $0x34] ss:$8 sps:$4 sm:$0xff]  }
   0x6   :  { %150 = vperm.xlu1 %902, %v127_v3   ;;  %144 = vperm.xlu0 %901, %v125_v4   ;;  %v133_v14 = vld [vmem:[%s1318_s2 + $0x48] sm:$0xff]  ;;  %v132_v15 = vld [vmem:[%s1318_s2 + $0x40] sm:$0xff]  ;;  %v135_v18 = vld [vmem:[%s1318_s2 + $0x58] sm:$0xff]  ;;  %v77_v53 = vadd.s32 8, %v76_v52  ;;  %v78_v55 = vadd.s32 16, %v76_v52  ;;  %v79_v56 = vadd.s32 24, %v76_v52 }
   0x7   :  { %341 = vmatpush1.bf16.msra.mxu0 %v905_v8  ;;  %v134_v19 = vld [vmem:[%s1318_s2 + $0x50] sm:$0xff]  ;;  %v915_v21 = vld [vmem:[%s1319_s0 + $0x44] ss:$8 sps:$4 sm:$0xff]   ;;  %v917_v24 = vld [vmem:[%s1319_s0 + $0x40] ss:$8 sps:$4 sm:$0xff]   ;;  %v80_v58 = vadd.s32 32, %v76_v52 }
   0x8   :  { %342 = vmatprep.subr.bf16.mxu0 %v906_v9  ;;  %v914_v20 = vld [vmem:[%s1319_s0 + $0x30] ss:$8 sps:$4 sm:$0xff]   ;;  %v137_v22 = vld [vmem:[%s1318_s2 + $0x68] sm:$0xff]  ;;  %v136_v23 = vld [vmem:[%s1318_s2 + $0x60] sm:$0xff]  ;;  %v81_v59 = vadd.s32 40, %v76_v52  ;;  %v82_v60 = vadd.s32 48, %v76_v52 }
   0x9   :  { %v918_v25 = vld [vmem:[%s1319_s0 + $0x54] ss:$8 sps:$4 sm:$0xff]   ;;  %v920_v28 = vld [vmem:[%s1319_s0 + $0x50] ss:$8 sps:$4 sm:$0xff]   ;;  %v921_v29 = vld [vmem:[%s1319_s0 + $0x64] ss:$8 sps:$4 sm:$0xff]  }
   0xa   :  { %156 = vperm.xlu1 %902, %v129_v5   ;;  %153 = vperm.xlu0 %901, %v128_v6   ;;  %v139_v26 = vld [vmem:[%s1318_s2 + $0x78] sm:$0xff]  ;;  %v138_v27 = vld [vmem:[%s1318_s2 + $0x70] sm:$0xff]  ;;  %v923_v30 = vld [vmem:[%s1319_s0 + $0x60] ss:$8 sps:$4 sm:$0xff]   ;;  %v83_v61 = vadd.s32 56, %v76_v52  ;;  %v85_v1 = vadd.s32 72, %v76_v52 }
   0xb   :  { %343 = vmatpush1.bf16.msra.mxu0 %v908_v12  ;;  %v924_v31 = vld [vmem:[%s1319_s0 + $0x74] ss:$8 sps:$4 sm:$0xff]   ;;  %v926_v32 = vld [vmem:[%s1319_s0 + $0x70] ss:$8 sps:$4 sm:$0xff]   ;;  %v818_v54 = vld [vmem:[%s1320_s3] ss:$0 sm:$0xff] }
   0xc   :  { %344 = vmatprep.subr.bf16.mxu0 %v909_v13  ;;  %v86_v2 = vadd.s32 80, %v76_v52  ;;  %v87_v3 = vadd.s32 88, %v76_v52  ;;  %v88_v6 = vadd.s32 96, %v76_v52  ;;  %v89_v7 = vadd.s32 104, %v76_v52  ;;  %v453_v12 = vld [vmem:[%s1321_s1] sm:$0xff]  ;;  %v454_v13 = vld [vmem:[%s1321_s1 + $0x8] sm:$0xff] }
   0xd   :  { %v90_v8 = vadd.s32 112, %v76_v52  ;;  %v91_v9 = vadd.s32 120, %v76_v52  ;;  %v460_v33 = vld [vmem:[%s1321_s1 + $0x38] sm:$0xff]  ;;  %v27_v57 = vld [vmem:[%s1322_s4 + $0x10] sm:$0xff]  ;;  %v25_v62 = vld [vmem:[%s1322_s4] sm:$0xff] }
   0xe   :  { %162 = vperm.xlu1 %902, %v131_v10   ;;  %159 = vperm.xlu0 %901, %v130_v11   ;;  %v28_v4 = vld [vmem:[%s1322_s4 + $0x18] sm:$0xff]  ;;  %v26_v11 = vld [vmem:[%s1322_s4 + $0x8] sm:$0xff] }
   0xf   :  { %345 = vmatpush1.bf16.msra.mxu0 %v911_v16 }
  0x10   :  { %346 = vmatprep.subr.bf16.mxu0 %v912_v17 }
  0x12   :  { %168 = vperm.xlu1 %902, %v133_v14   ;;  %165 = vperm.xlu0 %901, %v132_v15   ;;  %v455_v15 = vld [vmem:[%s1321_s1 + $0x10] sm:$0xff] }
  0x13   :  { %347 = vmatpush1.bf16.msra.mxu0 %v914_v20 }
  0x14   :  { %348 = vmatprep.subr.bf16.mxu0 %v915_v21 }
  0x16   :  { %174 = vperm.xlu1 %902, %v135_v18   ;;  %171 = vperm.xlu0 %901, %v134_v19   ;;  %v456_v18 = vld [vmem:[%s1321_s1 + $0x18] sm:$0xff] }
  0x17   :  { %349 = vmatpush1.bf16.msra.mxu0 %v917_v24 }
  0x18   :  { %350 = vmatprep.subr.bf16.mxu0 %v918_v25 }
  0x1a   :  { %180 = vperm.xlu1 %902, %v137_v22   ;;  %177 = vperm.xlu0 %901, %v136_v23  }
  0x1b   :  { %351 = vmatpush1.bf16.msra.mxu0 %v920_v28 }
  0x1c   :  { %352 = vmatprep.subr.bf16.mxu0 %v921_v29  ;;  %v459_v29 = vld [vmem:[%s1321_s1 + $0x30] sm:$0xff] }
  0x1e   :  { %186 = vperm.xlu1 %902, %v139_v26   ;;  %183 = vperm.xlu0 %901, %v138_v27   ;;  %v457_v26 = vld [vmem:[%s1321_s1 + $0x20] sm:$0xff]  ;;  %v458_v27 = vld [vmem:[%s1321_s1 + $0x28] sm:$0xff] }
  0x1f   :  { %353 = vmatpush1.bf16.msra.mxu0 %v923_v30 }
  0x20   :  { %354 = vmatprep.subr.bf16.mxu0 %v924_v31 }
  0x23   :  { %355 = vmatpush1.bf16.msra.mxu0 %v926_v32 }
  0x81   :  { %v142_v34 = vpop.permute.xlu0 %141  ;;  %v148_v37 = vpop.permute.xlu1 %147 }
  0x82   :  { %vm188_vm1 = vcmp.eq.s32.totalorder %v58_v35, %v142_v34  ;;  %vm190_vm3 = vcmp.eq.s32.totalorder %v58_v35, %v148_v37 }
  0x85   :  { %v145_v36 = vpop.permute.xlu0 %144  ;;  %v151_v39 = vpop.permute.xlu1 %150 }
  0x86   :  { %vm189_vm0 = vcmp.eq.s32.totalorder %v58_v35, %v145_v36  ;;  %vm191_vm4 = vcmp.eq.s32.totalorder %v58_v35, %v151_v39 }
  0x87   :  { %vm802_vm2 = vmpackc.low %vm189_vm0, %vm188_vm1 }
  0x88   :  { %803 = vmatmul.mubr.msk.bf16.vlgmr.msra.gmra.mrb[0].mxu0 %vm802_vm2, %v928_v38  ;;  %vm804_vm5 = vmpackc.low %vm191_vm4, %vm190_vm3 }
  0x89   :  { %382 = vmatprep.mubr.bf16.mxu0 %v927_v0  ;;  %v157_v40 = vpop.permute.xlu1 %156  ;;  %v154_v41 = vpop.permute.xlu0 %153 }
  0x8a   :  { %vm193_vm6 = vcmp.eq.s32.totalorder %v58_v35, %v157_v40  ;;  %vm192_vm7 = vcmp.eq.s32.totalorder %v58_v35, %v154_v41 }
  0x8b   :  { %vm806_vm8 = vmpackc.low %vm193_vm6, %vm192_vm7 }
  0x8d   :  { %v163_v42 = vpop.permute.xlu1 %162  ;;  %v160_v43 = vpop.permute.xlu0 %159 }
  0x8e   :  { %vm195_vm9 = vcmp.eq.s32.totalorder %v58_v35, %v163_v42  ;;  %vm194_vm10 = vcmp.eq.s32.totalorder %v58_v35, %v160_v43  ;;  %v461_v42 = vld [vmem:[%s1321_s1 + $0x40] sm:$0xff]  ;;  %v462_v43 = vld [vmem:[%s1321_s1 + $0x48] sm:$0xff] }
  0x8f   :  { %vm808_vm11 = vmpackc.low %vm195_vm9, %vm194_vm10  ;;  %vm566_vm9 = vcmp.eq.s32.totalorder %v77_v53, %v818_v54 }
  0x90   :  { %805 = vmatmul.mubr.msk.bf16.gmra.mrb[4].mxu0 %vm804_vm5, %v928_v38 }
  0x91   :  { %392 = vmatprep.mubr.bf16.mxu0 %v927_v0  ;;  %v169_v44 = vpop.permute.xlu1 %168  ;;  %v166_v45 = vpop.permute.xlu0 %165 }
  0x92   :  { %vm197_vm12 = vcmp.eq.s32.totalorder %v58_v35, %v169_v44  ;;  %vm196_vm13 = vcmp.eq.s32.totalorder %v58_v35, %v166_v45  ;;  %v463_v45 = vld [vmem:[%s1321_s1 + $0x50] sm:$0xff] }
  0x93   :  { %vm810_vm14 = vmpackc.low %vm197_vm12, %vm196_vm13  ;;  %vm568_vm12 = vcmp.eq.s32.totalorder %v79_v56, %v818_v54 }
  0x95   :  { %v175_v46 = vpop.permute.xlu1 %174  ;;  %v172_v47 = vpop.permute.xlu0 %171 }
  0x96   :  { %vm199_vm15 = vcmp.eq.s32.totalorder %v58_v35, %v175_v46  ;;  %vm198_vm0 = vcmp.eq.s32.totalorder %v58_v35, %v172_v47 }
  0x97   :  { %vm812_vm1 = vmpackc.low %vm199_vm15, %vm198_vm0  ;;  %vm570_vm15 = vcmp.eq.s32.totalorder %v81_v59, %v818_v54  ;;  %v466_v59 = vld [vmem:[%s1321_s1 + $0x68] sm:$0xff] }
  0x98   :  { %807 = vmatmul.mubr.msk.bf16.gmra.mrb[8].mxu0 %vm806_vm8, %v928_v38  ;;  %vm565_vm8 = vcmp.eq.s32.totalorder %v76_v52, %v818_v54 }
  0x99   :  { %402 = vmatprep.mubr.bf16.mxu0 %v927_v0  ;;  %v181_v48 = vpop.permute.xlu1 %180  ;;  %v178_v49 = vpop.permute.xlu0 %177  ;;  %vm835_vm10 = vmpackc.low %vm566_vm9, %vm565_vm8  ;;  %vm576_vm8 = vcmp.eq.s32.totalorder %v87_v3, %v818_v54  ;;  %v468_v3 = vld [vmem:[%s1321_s1 + $0x78] sm:$0xff] }
  0x9a   :  { %vm201_vm2 = vcmp.eq.s32.totalorder %v58_v35, %v181_v48  ;;  %vm200_vm3 = vcmp.eq.s32.totalorder %v58_v35, %v178_v49  ;;  %883 = vmatprep.mubr.msk.bf16.mxu1 %vm835_vm10, %v928_v38  ;;  %vm577_vm10 = vcmp.eq.s32.totalorder %v88_v6, %v818_v54  ;;  %v464_v49 = vld [vmem:[%s1321_s1 + $0x58] sm:$0xff] }
  0x9b   :  { %vm814_vm4 = vmpackc.low %vm201_vm2, %vm200_vm3  ;;  %vm572_vm2 = vcmp.eq.s32.totalorder %v83_v61, %v818_v54  ;;  %v467_v61 = vld [vmem:[%s1321_s1 + $0x70] sm:$0xff] }
  0x9d   :  { %v187_v50 = vpop.permute.xlu1 %186  ;;  %v184_v51 = vpop.permute.xlu0 %183 }
  0x9e   :  { %vm203_vm5 = vcmp.eq.s32.totalorder %v58_v35, %v187_v50  ;;  %vm202_vm6 = vcmp.eq.s32.totalorder %v58_v35, %v184_v51 }
  0x9f   :  { %vm816_vm7 = vmpackc.low %vm203_vm5, %vm202_vm6  ;;  %vm574_vm5 = vcmp.eq.s32.totalorder %v85_v1, %v818_v54 }
  0xa0   :  { %809 = vmatmul.mubr.msk.bf16.gmra.mrb[12].mxu0 %vm808_vm11, %v928_v38  ;;  %vm567_vm11 = vcmp.eq.s32.totalorder %v78_v55, %v818_v54 }
  0xa1   :  { %412 = vmatprep.mubr.bf16.mxu0 %v927_v0  ;;  %vm1077_vm13 = vmpackc.low %vm568_vm12, %vm567_vm11  ;;  %vm578_vm11 = vcmp.eq.s32.totalorder %v89_v7, %v818_v54 }
  0xa2   :  { %vm1097_vm12 = vmpackc.low %vm578_vm11, %vm577_vm10 }
  0xa8   :  { %811 = vmatmul.mubr.msk.bf16.gmra.mrb[16].mxu0 %vm810_vm14, %v928_v38  ;;  %vm569_vm14 = vcmp.eq.s32.totalorder %v80_v58, %v818_v54  ;;  %v465_v58 = vld [vmem:[%s1321_s1 + $0x60] sm:$0xff] }
  0xa9   :  { %422 = vmatprep.mubr.bf16.mxu0 %v927_v0  ;;  %vm1081_vm0 = vmpackc.low %vm570_vm15, %vm569_vm14  ;;  %vm579_vm14 = vcmp.eq.s32.totalorder %v90_v8, %v818_v54  ;;  %vm580_vm15 = vcmp.eq.s32.totalorder %v91_v9, %v818_v54 }
  0xb0   :  { %813 = vmatmul.mubr.msk.bf16.gmra.mrb[20].mxu0 %vm812_vm1, %v928_v38  ;;  %vm571_vm1 = vcmp.eq.s32.totalorder %v82_v60, %v818_v54 }
  0xb1   :  { %432 = vmatprep.mubr.bf16.mxu0 %v927_v0  ;;  %vm1085_vm3 = vmpackc.low %vm572_vm2, %vm571_vm1 }
  0xb2   :  { %vm1101_vm1 = vmpackc.low %vm580_vm15, %vm579_vm14 }
  0xb8   :  { %815 = vmatmul.mubr.msk.bf16.gmra.mrb[24].mxu0 %vm814_vm4, %v928_v38 }
  0xb9   :  { %442 = vmatprep.mubr.bf16.mxu0 %v927_v0  ;;  %v84_v0 = vadd.s32 64, %v76_v52 }
  0xbb   :  { %vm573_vm4 = vcmp.eq.s32.totalorder %v84_v0, %v818_v54 }
  0xbc   :  { %vm1089_vm6 = vmpackc.low %vm574_vm5, %vm573_vm4 }
  0xc0   :  { %817 = vmatmul.mubr.msk.bf16.gmra.mrb[28].mxu0 %vm816_vm7, %v928_v38  ;;  %vm575_vm7 = vcmp.eq.s32.totalorder %v86_v2, %v818_v54 }
  0xc1   :  { %vm1093_vm9 = vmpackc.low %vm576_vm8, %vm575_vm7 }
 0x15b   :  { %v374_v14 = vpop.f32.mrb[0].mxu0 }
 0x15c   :  { %v485_v16 = vmul.f32 %v453_v12, %v374_v14  ;;  %v376_v17 = vpop.f32.mrb[1].mxu0 }
 0x15d   :  { %v486_v19 = vmul.f32 %v454_v13, %v376_v17  ;;  %v378_v20 = vpop.f32.mrb[2].mxu0 }
 0x15e   :  { %v487_v21 = vmul.f32 %v455_v15, %v378_v20  ;;  %v380_v22 = vpop.f32.mrb[3].mxu0  ;;  %v469_v15 = vld [vmem:[%s1321_s1 + $0x80] sm:$0xff] }
 0x15f   :  { %v517_v23 = vadd.f32 %v486_v19, %v485_v16  ;;  %v488_v24 = vmul.f32 %v456_v18, %v380_v22  ;;  %v470_v16 = vld [vmem:[%s1321_s1 + $0x88] sm:$0xff]  ;;  %v471_v18 = vld [vmem:[%s1321_s1 + $0x90] sm:$0xff]  ;;  %v472_v22 = vld [vmem:[%s1321_s1 + $0x98] sm:$0xff] }
 0x161   :  { %v518_v25 = vadd.f32 %v488_v24, %v487_v21 }
 0x163   :  { %v384_v28 = vpop.f32.mrb[4].mxu0  ;;  %v533_v30 = vpack.c.bf16 %v518_v25, %v517_v23 }
 0x164   :  { %v489_v31 = vmul.f32 %v457_v26, %v384_v28  ;;  %v386_v32 = vpop.f32.mrb[5].mxu0 }
 0x165   :  { %v490_v34 = vmul.f32 %v458_v27, %v386_v32  ;;  %v388_v35 = vpop.f32.mrb[6].mxu0  ;;  %867 = vmatprep.subr.bf16.mxu1 %v533_v30 }
 0x166   :  { %v491_v36 = vmul.f32 %v459_v29, %v388_v35  ;;  %v390_v37 = vpop.f32.mrb[7].mxu0  ;;  %868 = vmatpush3.bf16.msra.mxu1 %v533_v30  ;;  %v473_v30 = vld [vmem:[%s1321_s1 + $0xa0] sm:$0xff] }
 0x167   :  { %v519_v39 = vadd.f32 %v490_v34, %v489_v31  ;;  %v492_v40 = vmul.f32 %v460_v33, %v390_v37  ;;  %v474_v31 = vld [vmem:[%s1321_s1 + $0xa8] sm:$0xff]  ;;  %v475_v33 = vld [vmem:[%s1321_s1 + $0xb0] sm:$0xff]  ;;  %v476_v37 = vld [vmem:[%s1321_s1 + $0xb8] sm:$0xff] }
 0x169   :  { %v520_v41 = vadd.f32 %v492_v40, %v491_v36 }
 0x16b   :  { %v394_v44 = vpop.f32.mrb[8].mxu0  ;;  %v534_v46 = vpack.c.bf16 %v520_v41, %v519_v39 }
 0x16c   :  { %v493_v47 = vmul.f32 %v461_v42, %v394_v44  ;;  %v396_v48 = vpop.f32.mrb[9].mxu0 }
 0x16d   :  { %v494_v50 = vmul.f32 %v462_v43, %v396_v48  ;;  %v398_v51 = vpop.f32.mrb[10].mxu0  ;;  %869 = vmatprep.subr.bf16.mxu1 %v534_v46 }
 0x16e   :  { %v495_v52 = vmul.f32 %v463_v45, %v398_v51  ;;  %v400_v53 = vpop.f32.mrb[11].mxu0  ;;  %870 = vmatpush3.bf16.msra.mxu1 %v534_v46  ;;  %v477_v46 = vld [vmem:[%s1321_s1 + $0xc0] sm:$0xff] }
 0x16f   :  { %v521_v54 = vadd.f32 %v494_v50, %v493_v47  ;;  %v496_v55 = vmul.f32 %v464_v49, %v400_v53  ;;  %v478_v47 = vld [vmem:[%s1321_s1 + $0xc8] sm:$0xff]  ;;  %v479_v49 = vld [vmem:[%s1321_s1 + $0xd0] sm:$0xff]  ;;  %v480_v53 = vld [vmem:[%s1321_s1 + $0xd8] sm:$0xff] }
 0x171   :  { %v522_v56 = vadd.f32 %v496_v55, %v495_v52 }
 0x173   :  { %v404_v60 = vpop.f32.mrb[12].mxu0  ;;  %v535_v0 = vpack.c.bf16 %v522_v56, %v521_v54 }
 0x174   :  { %v497_v1 = vmul.f32 %v465_v58, %v404_v60  ;;  %v406_v2 = vpop.f32.mrb[13].mxu0 }
 0x175   :  { %v498_v6 = vmul.f32 %v466_v59, %v406_v2  ;;  %v408_v7 = vpop.f32.mrb[14].mxu0  ;;  %871 = vmatprep.subr.bf16.mxu1 %v535_v0 }
 0x176   :  { %v499_v8 = vmul.f32 %v467_v61, %v408_v7  ;;  %v410_v9 = vpop.f32.mrb[15].mxu0  ;;  %872 = vmatpush3.bf16.msra.mxu1 %v535_v0  ;;  %v481_v0 = vld [vmem:[%s1321_s1 + $0xe0] sm:$0xff] }
 0x177   :  { %v523_v12 = vadd.f32 %v498_v6, %v497_v1  ;;  %v500_v13 = vmul.f32 %v468_v3, %v410_v9  ;;  %v482_v1 = vld [vmem:[%s1321_s1 + $0xe8] sm:$0xff]  ;;  %v483_v3 = vld [vmem:[%s1321_s1 + $0xf0] sm:$0xff]  ;;  %v484_v9 = vld [vmem:[%s1321_s1 + $0xf8] sm:$0xff] }
 0x179   :  { %v524_v14 = vadd.f32 %v500_v13, %v499_v8 }
 0x17b   :  { %v414_v17 = vpop.f32.mrb[16].mxu0  ;;  %v536_v19 = vpack.c.bf16 %v524_v14, %v523_v12 }
 0x17c   :  { %v501_v20 = vmul.f32 %v469_v15, %v414_v17  ;;  %v416_v21 = vpop.f32.mrb[17].mxu0 }
 0x17d   :  { %v502_v23 = vmul.f32 %v470_v16, %v416_v21  ;;  %v418_v24 = vpop.f32.mrb[18].mxu0  ;;  %873 = vmatprep.subr.bf16.mxu1 %v536_v19 }
 0x17e   :  { %v503_v25 = vmul.f32 %v471_v18, %v418_v24  ;;  %v420_v26 = vpop.f32.mrb[19].mxu0  ;;  %874 = vmatpush3.bf16.msra.mxu1 %v536_v19 }
 0x17f   :  { %v525_v27 = vadd.f32 %v502_v23, %v501_v20  ;;  %v504_v28 = vmul.f32 %v472_v22, %v420_v26 }
 0x181   :  { %v526_v29 = vadd.f32 %v504_v28, %v503_v25 }
 0x183   :  { %v424_v32 = vpop.f32.mrb[20].mxu0  ;;  %v537_v34 = vpack.c.bf16 %v526_v29, %v525_v27 }
 0x184   :  { %v505_v35 = vmul.f32 %v473_v30, %v424_v32  ;;  %v426_v36 = vpop.f32.mrb[21].mxu0 }
 0x185   :  { %v506_v39 = vmul.f32 %v474_v31, %v426_v36  ;;  %v428_v40 = vpop.f32.mrb[22].mxu0  ;;  %875 = vmatprep.subr.bf16.mxu1 %v537_v34 }
 0x186   :  { %v507_v41 = vmul.f32 %v475_v33, %v428_v40  ;;  %v430_v42 = vpop.f32.mrb[23].mxu0  ;;  %876 = vmatpush3.bf16.msra.mxu1 %v537_v34 }
 0x187   :  { %v527_v43 = vadd.f32 %v506_v39, %v505_v35  ;;  %v508_v44 = vmul.f32 %v476_v37, %v430_v42 }
 0x189   :  { %v528_v45 = vadd.f32 %v508_v44, %v507_v41 }
 0x18b   :  { %v434_v48 = vpop.f32.mrb[24].mxu0  ;;  %v538_v50 = vpack.c.bf16 %v528_v45, %v527_v43 }
 0x18c   :  { %v509_v51 = vmul.f32 %v477_v46, %v434_v48  ;;  %v436_v52 = vpop.f32.mrb[25].mxu0 }
 0x18d   :  { %v510_v54 = vmul.f32 %v478_v47, %v436_v52  ;;  %v438_v55 = vpop.f32.mrb[26].mxu0  ;;  %877 = vmatprep.subr.bf16.mxu1 %v538_v50 }
 0x18e   :  { %v511_v56 = vmul.f32 %v479_v49, %v438_v55  ;;  %v440_v58 = vpop.f32.mrb[27].mxu0  ;;  %878 = vmatpush3.bf16.msra.mxu1 %v538_v50 }
 0x18f   :  { %v529_v59 = vadd.f32 %v510_v54, %v509_v51  ;;  %v512_v60 = vmul.f32 %v480_v53, %v440_v58 }
 0x191   :  { %v530_v61 = vadd.f32 %v512_v60, %v511_v56 }
 0x193   :  { %v444_v2 = vpop.f32.mrb[28].mxu0  ;;  %v539_v6 = vpack.c.bf16 %v530_v61, %v529_v59 }
 0x194   :  { %v513_v7 = vmul.f32 %v481_v0, %v444_v2  ;;  %v446_v8 = vpop.f32.mrb[29].mxu0 }
 0x195   :  { %v514_v12 = vmul.f32 %v482_v1, %v446_v8  ;;  %v448_v13 = vpop.f32.mrb[30].mxu0  ;;  %879 = vmatprep.subr.bf16.mxu1 %v539_v6 }
 0x196   :  { %v515_v14 = vmul.f32 %v483_v3, %v448_v13  ;;  %v450_v15 = vpop.f32.mrb[31].mxu0  ;;  %880 = vmatpush3.bf16.msra.mxu1 %v539_v6 }
 0x197   :  { %v531_v16 = vadd.f32 %v514_v12, %v513_v7  ;;  %v516_v17 = vmul.f32 %v484_v9, %v450_v15 }
 0x199   :  { %v532_v18 = vadd.f32 %v516_v17, %v515_v14 }
 0x19b   :  { %v540_v19 = vpack.c.bf16 %v532_v18, %v531_v16 }
 0x19d   :  { %881 = vmatprep.subr.bf16.mxu1 %v540_v19 }
 0x19e   :  { %882 = vmatpush3.bf16.msra.mxu1 %v540_v19 }
 0x1a1   :  { %884 = vmatmul.mubr.msk.bf16.vlgmr.msra.gmra.mrb[0].mxu1 %vm1077_vm13, %v928_v38 }
 0x1a2   :  { %887 = vmatprep.mubr.msk.bf16.mxu1 %vm1081_vm0, %v928_v38 }
 0x1a9   :  { %888 = vmatmul.mubr.msk.bf16.gmra.mrb[4].mxu1 %vm1085_vm3, %v928_v38 }
 0x1aa   :  { %891 = vmatprep.mubr.msk.bf16.mxu1 %vm1089_vm6, %v928_v38 }
 0x1b1   :  { %892 = vmatmul.mubr.msk.bf16.gmra.mrb[8].mxu1 %vm1093_vm9, %v928_v38 }
 0x1b2   :  { %895 = vmatprep.mubr.msk.bf16.mxu1 %vm1097_vm12, %v928_v38 }
 0x1b9   :  { %896 = vmatmul.mubr.msk.bf16.gmra.mrb[12].mxu1 %vm1101_vm1, %v928_v38 }
 0x274   :  { %v885_v63 = vpop.f32.mrb[0].mxu1 }
 0x275   :  { %v736_v5 = vadd.f32 %v885_v63, %v27_v57  ;;  %v671_v10 = vpop.f32.mrb[1].mxu1 }
 0x276   :  { %v734_v38 = vadd.f32 %v671_v10, %v25_v62  ;;  %v886_v20 = vpop.f32.mrb[2].mxu1 }
 0x277   :  { %752 = vst [vmem:[%s1323_s5 + $0x10] sm:$0xff] %v736_v5  ;;  %v737_v21 = vadd.f32 %v886_v20, %v28_v4  ;;  %v674_v22 = vpop.f32.mrb[3].mxu1 }
 0x278   :  { %750 = vst [vmem:[%s1323_s5] sm:$0xff] %v734_v38  ;;  %v735_v23 = vadd.f32 %v674_v22, %v26_v11 }
 0x279   :  { %753 = vst [vmem:[%s1323_s5 + $0x18] sm:$0xff] %v737_v21 }
 0x27a   :  { %751 = vst [vmem:[%s1323_s5 + $0x8] sm:$0xff] %v735_v23 }
 0x27c   :  { %v889_v26 = vpop.f32.mrb[4].mxu1 }
 0x27d   :  { %v687_v29 = vpop.f32.mrb[5].mxu1 }
 0x27e   :  { %v890_v32 = vpop.f32.mrb[6].mxu1 }
 0x27f   :  { %v690_v34 = vpop.f32.mrb[7].mxu1 }
 0x281   :  { %v31_v24 = vld [vmem:[%s1322_s4 + $0x30] sm:$0xff]  ;;  %v29_v25 = vld [vmem:[%s1322_s4 + $0x20] sm:$0xff]  ;;  %v32_v27 = vld [vmem:[%s1322_s4 + $0x38] sm:$0xff] }
 0x282   :  { %v740_v28 = vadd.f32 %v889_v26, %v31_v24  ;;  %v30_v30 = vld [vmem:[%s1322_s4 + $0x28] sm:$0xff]  ;;  %v738_v31 = vadd.f32 %v687_v29, %v29_v25  ;;  %v741_v33 = vadd.f32 %v890_v32, %v32_v27 }
 0x283   :  { %v739_v35 = vadd.f32 %v690_v34, %v30_v30 }
 0x284   :  { %756 = vst [vmem:[%s1323_s5 + $0x30] sm:$0xff] %v740_v28  ;;  %754 = vst [vmem:[%s1323_s5 + $0x20] sm:$0xff] %v738_v31  ;;  %v893_v39 = vpop.f32.mrb[8].mxu1 }
 0x285   :  { %757 = vst [vmem:[%s1323_s5 + $0x38] sm:$0xff] %v741_v33  ;;  %755 = vst [vmem:[%s1323_s5 + $0x28] sm:$0xff] %v739_v35  ;;  %v703_v42 = vpop.f32.mrb[9].mxu1 }
 0x286   :  { %v894_v45 = vpop.f32.mrb[10].mxu1 }
 0x287   :  { %v706_v47 = vpop.f32.mrb[11].mxu1 }
 0x28c   :  { %v35_v36 = vld [vmem:[%s1322_s4 + $0x50] sm:$0xff]  ;;  %v33_v37 = vld [vmem:[%s1322_s4 + $0x40] sm:$0xff]  ;;  %v36_v40 = vld [vmem:[%s1322_s4 + $0x58] sm:$0xff]  ;;  %v897_v51 = vpop.f32.mrb[12].mxu1 }
 0x28d   :  { %v744_v41 = vadd.f32 %v893_v39, %v35_v36  ;;  %v34_v43 = vld [vmem:[%s1322_s4 + $0x48] sm:$0xff]  ;;  %v742_v44 = vadd.f32 %v703_v42, %v33_v37  ;;  %v745_v46 = vadd.f32 %v894_v45, %v36_v40  ;;  %v719_v54 = vpop.f32.mrb[13].mxu1 }
 0x28e   :  { %v743_v48 = vadd.f32 %v706_v47, %v34_v43  ;;  %v898_v58 = vpop.f32.mrb[14].mxu1 }
 0x28f   :  { %760 = vst [vmem:[%s1323_s5 + $0x50] sm:$0xff] %v744_v41  ;;  %758 = vst [vmem:[%s1323_s5 + $0x40] sm:$0xff] %v742_v44  ;;  %v722_v60 = vpop.f32.mrb[15].mxu1 }
 0x290   :  { %761 = vst [vmem:[%s1323_s5 + $0x58] sm:$0xff] %v745_v46  ;;  %759 = vst [vmem:[%s1323_s5 + $0x48] sm:$0xff] %v743_v48 }
 0x297   :  { %v39_v49 = vld [vmem:[%s1322_s4 + $0x70] sm:$0xff]  ;;  %v37_v50 = vld [vmem:[%s1322_s4 + $0x60] sm:$0xff]  ;;  %v40_v52 = vld [vmem:[%s1322_s4 + $0x78] sm:$0xff] }
 0x298   :  { %v748_v53 = vadd.f32 %v897_v51, %v39_v49  ;;  %v38_v55 = vld [vmem:[%s1322_s4 + $0x68] sm:$0xff]  ;;  %v746_v56 = vadd.f32 %v719_v54, %v37_v50  ;;  %v749_v59 = vadd.f32 %v898_v58, %v40_v52 }
 0x299   :  { %v747_v61 = vadd.f32 %v722_v60, %v38_v55 }
 0x29a   :  { %764 = vst [vmem:[%s1323_s5 + $0x70] sm:$0xff] %v748_v53  ;;  %762 = vst [vmem:[%s1323_s5 + $0x60] sm:$0xff] %v746_v56 }
 0x29b   :  { %765 = vst [vmem:[%s1323_s5 + $0x78] sm:$0xff] %v749_v59  ;;  %763 = vst [vmem:[%s1323_s5 + $0x68] sm:$0xff] %v747_v61 }

</bundles_post_ra>
